<compile_context>
chip_gen: v6e
topology: v6e:2x2x1
jax: 0.10.0
libtpu: 0.0.40
codegen_flags: <defaults>
</compile_context>

<pallas_src>
from functools import partial

import jax
import jax.numpy as jnp
from jax.experimental import pallas as pl
from jax.experimental.pallas import tpu as pltpu

# --- model configuration ------------------------------------------------------
INPUT_LAYER = 32
OUTPUT_LAYER = 16
LAYER_SIZE = 128
LANE = 128
SUBLANE = 8
TILE_M = 256  # M tile when the batch is large; multiple of 8 sublanes

LAYER_DIMS = [
    (INPUT_LAYER, LAYER_SIZE),          # hidden1
    (LAYER_SIZE, LAYER_SIZE * 2),       # hidden2
    (LAYER_SIZE * 2, LAYER_SIZE * 3),   # hidden3
    (LAYER_SIZE * 3, LAYER_SIZE * 4),   # hidden4
    (LAYER_SIZE * 4, LAYER_SIZE * 3),   # hidden5
    (LAYER_SIZE * 3, LAYER_SIZE * 2),   # hidden6
    (LAYER_SIZE * 2, LAYER_SIZE),       # hidden7
    (LAYER_SIZE, OUTPUT_LAYER),         # hidden8
]


# --- Pallas kernel: single fused affine map (x @ W_eff + b_eff) ---------------
def _affine_kernel(x_ref, w_ref, b_ref, o_ref):
    o_ref[...] = (
        jnp.dot(x_ref[...], w_ref[...], preferred_element_type=jnp.float32)
        + b_ref[...]
    ).astype(o_ref.dtype)


# --- one-time parameter preparation (NOT inside the per-call jit) --------------
def prepare_params(params):
    """Fold the 8 Linear layers into one affine map and lane-pad the output.

    Returns (w_eff (K0, N_pad) f32, b_eff (1, N_pad) f32, n_out).
    """
    w0, b0 = params[0]
    w_eff = w0.astype(jnp.float32)
    b_eff = b0.astype(jnp.float32)
    for w, b in params[1:]:
        w = w.astype(jnp.float32)
        w_eff = jnp.dot(w_eff, w, precision=jax.lax.Precision.HIGHEST)
        b_eff = jnp.dot(b_eff, w, precision=jax.lax.Precision.HIGHEST) + b
    n_out = w_eff.shape[1]
    pad = (-n_out) % LANE
    if pad:
        w_eff = jnp.pad(w_eff, ((0, 0), (0, pad)))
        b_eff = jnp.pad(b_eff, ((0, pad),))
    return w_eff, b_eff.reshape(1, -1), n_out


# --- jitted forward: single pallas_call, M-tiled grid --------------------------
@partial(jax.jit, static_argnums=(3,))
def network_forward(x, w_eff, b_eff, n_out):
    """x: (M, INPUT_LAYER) f32.  Returns (M, n_out) f32."""
    M, K = x.shape
    Np = w_eff.shape[1]

    # Pad batch to a multiple of 8 sublanes, then to a multiple of the M tile.
    m8 = ((M + SUBLANE - 1) // SUBLANE) * SUBLANE
    tm = min(TILE_M, m8)
    mp = ((m8 + tm - 1) // tm) * tm
    if mp != M:
        x = jnp.pad(x, ((0, mp - M), (0, 0)))

    out = pl.pallas_call(
        _affine_kernel,
        out_shape=jax.ShapeDtypeStruct((mp, Np), jnp.float32),
        grid=(mp // tm,),
        in_specs=[
            pl.BlockSpec((tm, K), lambda i: (i, 0)),   # x tile
            pl.BlockSpec((K, Np), lambda i: (0, 0)),   # folded weight, resident
            pl.BlockSpec((1, Np), lambda i: (0, 0)),   # folded bias, resident
        ],
        out_specs=pl.BlockSpec((tm, Np), lambda i: (i, 0)),
        compiler_params=pltpu.CompilerParams(
            dimension_semantics=("parallel",),
            vmem_limit_bytes=64 << 20,
        ),
    )(x, w_eff, b_eff)
    return out[:M, :n_out]


# --- parameter init (deterministic, mirrors torch.nn.Linear default init) -----
def init_params(key):
    params = []
    for fan_in, fan_out in LAYER_DIMS:
        key, kw, kb = jax.random.split(key, 3)
        bound = 1.0 / jnp.sqrt(jnp.float32(fan_in))
        # stored as (in, out) == torch W^T, so forward is x @ W + b
        w = jax.random.uniform(
            kw, (fan_in, fan_out), jnp.float32, minval=-bound, maxval=bound
        )
        b = jax.random.uniform(
            kb, (fan_out,), jnp.float32, minval=-bound, maxval=bound
        )
        params.append((w, b))
    return params


def network_reference(x, params):
    """Layer-by-layer f32 reference (matches the PyTorch forward)."""
    for w, b in params:
        x = jnp.dot(x, w, precision=jax.lax.Precision.HIGHEST) + b
    return x


if __name__ == "__main__":
    key = jax.random.PRNGKey(0)
    key, kx = jax.random.split(key)

    batch = 2
    x = jax.random.normal(kx, (batch, INPUT_LAYER), jnp.float32)
    params = init_params(key)

    # One-time prep: fold the 8 Linears into a single affine map.
    w_eff, b_eff, n_out = prepare_params(params)
    w_eff = jax.block_until_ready(w_eff)

    out = network_forward(x, w_eff, b_eff, n_out)
    out = jax.block_until_ready(out)

    ref = network_reference(x, params)
    assert out.shape == (batch, OUTPUT_LAYER)
    assert jnp.allclose(out, ref, atol=2e-3, rtol=2e-3), float(
        jnp.max(jnp.abs(out - ref))
    )

    print("KERNEL_OK")
</pallas_src>

<mosaic_0001>
module attributes {stable_mosaic.version = 11 : i64} {
  func.func @_affine_kernel(%arg0: i32, %arg1: memref<8x32xf32, #tpu.memory_space<vmem>>, %arg2: memref<32x128xf32, #tpu.memory_space<vmem>>, %arg3: memref<1x128xf32, #tpu.memory_space<vmem>>, %arg4: memref<8x128xf32, #tpu.memory_space<vmem>>) attributes {dimension_semantics = [#tpu.dimension_semantics<parallel>], iteration_bounds = array<i64: 1>, scalar_prefetch = 0 : i64, scratch_operands = 0 : i64, tpu.core_type = #tpu.core_type<tc>, window_params = [{transform_indices = @transform_0, window_bounds = array<i64: 8, 32>}, {pipeline_mode = #tpu.pipeline_mode<synchronous>, transform_indices = @transform_1, window_bounds = array<i64: 32, 128>}, {pipeline_mode = #tpu.pipeline_mode<synchronous>, transform_indices = @transform_2, window_bounds = array<i64: 1, 128>}, {transform_indices = @transform_3, window_bounds = array<i64: 8, 128>}]} {
    %c0 = arith.constant 0 : index
    %c0_0 = arith.constant 0 : index
    %0 = vector.load %arg1[%c0, %c0_0] : memref<8x32xf32, #tpu.memory_space<vmem>>, vector<8x32xf32>
    %c0_1 = arith.constant 0 : index
    %c0_2 = arith.constant 0 : index
    %1 = vector.load %arg2[%c0_1, %c0_2] : memref<32x128xf32, #tpu.memory_space<vmem>>, vector<32x128xf32>
    %cst = arith.constant dense<0.000000e+00> : vector<8x128xf32>
    %2 = tpu.matmul %0, %1, %cst {dimension_numbers = #tpu.dot_dimension_numbers<[1], [0], [0], [1], [0, 0, 1, 1], [], []>} : vector<8x32xf32>, vector<32x128xf32>, vector<8x128xf32> -> vector<8x128xf32>
    %c0_3 = arith.constant 0 : index
    %c0_4 = arith.constant 0 : index
    %3 = vector.load %arg3[%c0_3, %c0_4] : memref<1x128xf32, #tpu.memory_space<vmem>>, vector<1x128xf32>
    %4 = vector.broadcast %3 : vector<1x128xf32> to vector<8x128xf32>
    %5 = arith.addf %2, %4 : vector<8x128xf32>
    %c0_5 = arith.constant 0 : index
    %c0_6 = arith.constant 0 : index
    %6 = vector.load %arg4[%c0_5, %c0_6] : memref<8x128xf32, #tpu.memory_space<vmem>>, vector<8x128xf32>
    tpu.vector_store %arg4[%c0_5, %c0_6], %5 {strides = array<i32>} : memref<8x128xf32, #tpu.memory_space<vmem>>, vector<8x128xf32>,
    return
  }
  func.func @transform_0(%arg0: i32) -> (i32, i32) {
    %c0_i32 = arith.constant 0 : i32
    %c0_i32_0 = arith.constant 0 : i32
    return %arg0, %c0_i32 : i32, i32
  }
  func.func @transform_1(%arg0: i32) -> (i32, i32) {
    %c0_i32 = arith.constant 0 : i32
    %c0_i32_0 = arith.constant 0 : i32
    %c0_i32_1 = arith.constant 0 : i32
    return %c0_i32, %c0_i32_0 : i32, i32
  }
  func.func @transform_2(%arg0: i32) -> (i32, i32) {
    %c0_i32 = arith.constant 0 : i32
    %c0_i32_0 = arith.constant 0 : i32
    %c0_i32_1 = arith.constant 0 : i32
    return %c0_i32, %c0_i32_0 : i32, i32
  }
  func.func @transform_3(%arg0: i32) -> (i32, i32) {
    %c0_i32 = arith.constant 0 : i32
    %c0_i32_0 = arith.constant 0 : i32
    return %arg0, %c0_i32 : i32, i32
  }
}

</mosaic_0001>

<bundles_post_ra>
// kernel: network_forward.1
= control target key start
LH: loop header
LB: loop body
LE: loop exit
PB: predicated region body
PF: predicated region fallthrough
CT: control target
= control target key end

     0   :  { %8 = vsyncpa [#allocation3], 0  ;;  %s165_s12 = smov [#allocation2]   ;;  %s202_s0 = inlined_call_operand.vmem [shape: f32[8,32], index: 0, kind: input, shape index: {}]   ;;  %s203_s1 = inlined_call_operand.hbm [shape: f32[32,128], index: 1, kind: input, shape index: {}]   ;;  %s204_s2 = inlined_call_operand.vmem [shape: f32[1,128], index: 2, kind: input, shape index: {}]   ;;  %s205_s3 = inlined_call_operand.vmem [shape: f32[8,128], index: 3, kind: output, shape index: {}]  }
   0x1   :  { %s16_s13 = sshll.u32 %s165_s12, 4  ;;  %s17_s13 = int_to_ptr.vmem [resolvable:$true] %s16_s13 }
   0x2   :  { %s151_s14 = scalar_lea.vmem %s17_s13, 512  ;;  %p156_p1 = scmp.lt.s32.totalorder %s17_s13, %s17_s13 }
   0x3   :  { %p152_p0 = scmp.ne.s32.totalorder %s17_s13, %s151_s14  ;;  %p157_p2 = scmp.lt.s32.totalorder %s151_s14, %s151_s14 }
   0x5   :  { %p158_p3 = por %p157_p2, %p156_p1 }
   0x7   :  { %p159_p4 = pnand %p158_p3, %p152_p0 }
   0x9   :  { %162 = shalt.err (!%p159_p4)
}
   0xa   :  { %s166_s15 = smov 128   ;;  %s167_s16 = smov 8  }
   0xb   :  { %22 = dma.hbm_to_vmem [thread:$0]  %s203_s1, 512, %s17_s13, [#allocation3], %s166_s15, %s166_s15, %s167_s16  }
   0xc   :  { %163 = dma.done.wait [#allocation3], 512  }
   0xd   :  { %164 = vsyncadd [#allocation3], 4294966784  ;;  %v168_v0 = vmov 0.0   ;;  %vm169_vm0 = vmmov 0   ;;  %v32_v1 = vld [vmem:[#allocation2 + $0x18] sm:$0xff]  ;;  %v31_v2 = vld [vmem:[#allocation2 + $0x10] sm:$0xff] }
   0xe   :  { %127 = vmatprep.subr.mxu0 %v168_v0  ;;  %135 = vmatprep.mubr.msk.f32.mxu0 %vm169_vm0, %v168_v0  ;;  %v30_v3 = vld [vmem:[#allocation2 + $0x8] sm:$0xff]  ;;  %v29_v4 = vld [vmem:[#allocation2] sm:$0xff]  ;;  %vm40_vm1 = vcmask 261120  }
   0xf   :  { %128 = vmatpush3.msra.mxu0 %v32_v1  ;;  %v28_v5 = vld [vmem:[%s202_s0] sm:$0xff] }
  0x10   :  { %129 = vmatprep.subr.mxu0 %v168_v0  ;;  %v120_v6 = vld [vmem:[%s204_s2] ss:$0 sm:$0xff] }
  0x11   :  { %130 = vmatpush3.msra.mxu0 %v31_v2 }
  0x12   :  { %131 = vmatprep.subr.mxu0 %v168_v0 }
  0x13   :  { %132 = vmatpush3.msra.mxu0 %v30_v3 }
  0x14   :  { %133 = vmatprep.subr.mxu0 %v168_v0 }
  0x15   :  { %134 = vmatpush3.msra.mxu0 %v29_v4 }
  0x16   :  { %136 = vmatmul.mubr.msk.f32.vlgmr.msra.gmra.mxu0 %vm40_vm1, %v28_v5 }
  0xd6   :  { %v110_v7 = vpop.f32.mrf.mxu0 }
  0xd7   :  { %v111_v8 = vadd.f32 %v120_v6, %v110_v7 }
  0xd8   :  { %v137_v9 = vpop.f32.mrf.mxu0 }
  0xd9   :  { %114 = vst [vmem:[%s205_s3] sm:$0xff] %v111_v8 }
  0xda   :  { %119 = vsyncpa [#allocation3], 1 }

</bundles_post_ra>
